<compile_context>
chip_gen: v7x
topology: tpu7x:2x2x1
jax: 0.10.0
libtpu: 0.0.40
codegen_flags: <defaults>
</compile_context>

<pallas_src>
import functools

import jax
import jax.numpy as jnp
from jax.experimental import pallas as pl
from jax.experimental.pallas import tpu as pltpu

_LANE = 128

# Scoped-VMEM cap handed to Mosaic.  64 MiB is <= physical VMEM on every
# generation (v5e/v6e: 128 MiB, v7x: 64 MiB).  The tiled working set below is
# only a few MiB, so this is headroom (prevents spurious limit rejections at
# large N), not a requirement.
_VMEM_LIMIT_BYTES = 64 * 1024 * 1024


# ---------------------------------------------------------------------------
# Small helpers
# ---------------------------------------------------------------------------
def _round_up(x, m):
    return ((x + m - 1) // m) * m


def _largest_divisor_tile(n, candidates):
    for c in candidates:
        if n % c == 0:
            return c
    return _LANE


def _pad_to(x, shape):
    """Zero-pad a 2-D array up to `shape` (no-op when already that shape)."""
    pads = tuple((0, t - s) for s, t in zip(x.shape, shape))
    if all(p == (0, 0) for p in pads):
        return x
    return jnp.pad(x, pads)


def _cast(x, dtype):
    return x if x.dtype == dtype else x.astype(dtype)


# ---------------------------------------------------------------------------
# Kernel A: three chained GNN layers, adj streamed in row tiles.
# ---------------------------------------------------------------------------
def _gnn_layers_kernel(z0_ref, w_ref, adj_ref, z_ref, h_ref, *,
                       tile_m, compute_dtype):
    """One grid step = (layer l, row tile i).

      l = program_id(0) in [0, 3)  -- sequential layer chain
      i = program_id(1) in [0, T)  -- row tiles of adj / z

    z_ref  : resident (N_p, F_p) f32 output block; holds z_{l-1} when a layer
             starts and accumulates z_l rows as they are produced.
    h_ref  : (N_p, F_p) VMEM scratch in the MXU compute dtype;
             h = tanh(z_{l-1} @ W_l), recomputed once per layer (i == 0).
    adj_ref: streamed (tile_m, N_p) adj row tile, already in compute dtype.
    """
    l = pl.program_id(0)
    i = pl.program_id(1)

    # Seed the resident z buffer with the decoder input, once.
    @pl.when((l == 0) & (i == 0))
    def _():
        z_ref[...] = z0_ref[...]

    # Start of each layer: h = tanh(z_prev @ W_l) for all N rows (tiny matmul).
    @pl.when(i == 0)
    def _():
        zw = jnp.dot(_cast(z_ref[...], compute_dtype), w_ref[0],
                     preferred_element_type=jnp.float32)
        h_ref[...] = jnp.tanh(zw).astype(h_ref.dtype)  # tanh in f32 (v5e-safe)

    # This row tile: z_l[rows] = adj[rows, :] @ h   (f32 MXU accumulation)
    zt = jnp.dot(adj_ref[...], h_ref[...], preferred_element_type=jnp.float32)
    row0 = pl.multiple_of(i * tile_m, tile_m)
    z_ref[pl.ds(row0, tile_m), :] = zt


# ---------------------------------------------------------------------------
# Kernel B: adj_hat tile = sigmoid(z[rows] @ z[cols].T), no explicit transpose.
# ---------------------------------------------------------------------------
def _gram_sigmoid_kernel(zr_ref, zc_ref, out_ref):
    g = jax.lax.dot_general(
        zr_ref[...], zc_ref[...],
        dimension_numbers=(((1,), (1,)), ((), ())),   # contract feature dims
        preferred_element_type=jnp.float32)
    out_ref[...] = jax.nn.sigmoid(g).astype(out_ref.dtype)


# ---------------------------------------------------------------------------
# Wrapper
# ---------------------------------------------------------------------------
def igae_decoder_forward(z_igae, adj, params, *, bf16_matmul=True,
                         adj_hat_dtype=jnp.float32):
    """IGAE_decoder forward.  bf16_matmul=True uses bf16 MXU operands with f32
    accumulation (default; ~3-4x MXU throughput on v5e/v6e/v7x); set False for
    bit-conservative f32 operands."""
    w1, w2, w3 = params["w1"], params["w2"], params["w3"]
    n, f_in = z_igae.shape
    f2, f3, f_out = w1.shape[1], w2.shape[1], w3.shape[1]

    compute_dtype = jnp.bfloat16 if bf16_matmul else jnp.float32
    cbytes = 2 if bf16_matmul else 4
    out_bytes = 2 if adj_hat_dtype == jnp.bfloat16 else 4

    # Pad lane-dense.  All feature dims share one padded width F_p so the
    # three weights stack into a single [3, F_p, F_p] operand and z / h keep a
    # single shape.  Zero padding is exact: tanh(0)=0 and zero rows/cols of
    # adj / W contribute nothing; padded adj_hat entries are sliced away.
    n_p = _round_up(n, _LANE)
    f_p = max(_round_up(d, _LANE) for d in (f_in, f2, f3, f_out))

    tile_m = _largest_divisor_tile(n_p, (512, 256, 128))            # adj/z rows
    tile_n = _largest_divisor_tile(n_p, (2048, 1024, 512, 256, 128))  # adj_hat cols
    n_row_tiles = n_p // tile_m
    n_col_tiles = n_p // tile_n

    # Casts happen once, wrapper-side (bf16 halves adj's HBM->VMEM DMA bytes
    # and its VMEM footprint; no in-kernel N^2 converts).
    z0_p = _pad_to(_cast(z_igae, jnp.float32), (n_p, f_p))
    adj_p = _pad_to(_cast(adj, compute_dtype), (n_p, n_p))
    w_stack = jnp.stack([_pad_to(_cast(w, compute_dtype), (f_p, f_p))
                         for w in (w1, w2, w3)])

    # ---- Kernel A: z3 = adj @ tanh(adj @ tanh(adj @ tanh(z0 W1) W2) W3) ----
    adj_spec_kwargs = {}
    if n_row_tiles >= 3:
        # Per-tile compute is short for small F; deepen the adj pipeline.
        adj_spec_kwargs["pipeline_mode"] = pl.Buffered(3)
    adj_spec = pl.BlockSpec((tile_m, n_p), lambda l, i: (i, 0),
                            **adj_spec_kwargs)

    cost_a = pl.CostEstimate(
        flops=3 * 2 * n_p * f_p * f_p + 3 * 2 * n_p * n_p * f_p,
        transcendentals=3 * n_p * f_p,
        bytes_accessed=3 * n_p * n_p * cbytes + 2 * n_p * f_p * 4
                       + 3 * f_p * f_p * cbytes,
    )
    z3_p = pl.pallas_call(
        functools.partial(_gnn_layers_kernel, tile_m=tile_m,
                          compute_dtype=compute_dtype),
        out_shape=jax.ShapeDtypeStruct((n_p, f_p), jnp.float32),
        grid_spec=pltpu.PrefetchScalarGridSpec(
            num_scalar_prefetch=0,
            grid=(3, n_row_tiles),
            in_specs=[
                pl.BlockSpec((n_p, f_p), lambda l, i: (0, 0)),        # z0 (resident)
                pl.BlockSpec((1, f_p, f_p), lambda l, i: (l, 0, 0)),  # W_l
                adj_spec,                                             # adj row tile
            ],
            out_specs=pl.BlockSpec((n_p, f_p), lambda l, i: (0, 0)),  # z (resident)
            scratch_shapes=[pltpu.VMEM((n_p, f_p), compute_dtype)],   # h
        ),
        compiler_params=pltpu.CompilerParams(
            # Both axes carry state (layer chain / resident z) -> sequential.
            dimension_semantics=("arbitrary", "arbitrary"),
            vmem_limit_bytes=_VMEM_LIMIT_BYTES),
        cost_estimate=cost_a,
    )(z0_p, w_stack, adj_p)

    # ---- Kernel B: adj_hat = sigmoid(z3 @ z3.T), tiled over both dims ------
    z3_c = _cast(z3_p, compute_dtype)   # one small N x F cast; halves B's DMA
    cost_b = pl.CostEstimate(
        flops=2 * n_p * n_p * f_p,
        transcendentals=n_p * n_p,
        bytes_accessed=2 * n_p * f_p * cbytes + n_p * n_p * out_bytes,
    )
    adj_hat_p = pl.pallas_call(
        _gram_sigmoid_kernel,
        out_shape=jax.ShapeDtypeStruct((n_p, n_p), adj_hat_dtype),
        grid_spec=pltpu.PrefetchScalarGridSpec(
            num_scalar_prefetch=0,
            grid=(n_row_tiles, n_col_tiles),
            in_specs=[
                pl.BlockSpec((tile_m, f_p), lambda i, j: (i, 0)),  # z row tile
                pl.BlockSpec((tile_n, f_p), lambda i, j: (j, 0)),  # z col tile
            ],
            out_specs=pl.BlockSpec((tile_m, tile_n), lambda i, j: (i, j)),
        ),
        compiler_params=pltpu.CompilerParams(
            # Independent output tiles -> both v7x TensorCores share the
            # dominant N^2 work.  (No-op on single-TC v5e/v6e.)
            dimension_semantics=("parallel", "parallel"),
            vmem_limit_bytes=_VMEM_LIMIT_BYTES),
        cost_estimate=cost_b,
    )(z3_c, z3_c)

    # Slice padded outputs back to logical shapes.
    return z3_p[:n, :f_out], adj_hat_p[:n, :n]


# ---------------------------------------------------------------------------
# Parameter init (xavier_uniform, matching torch.nn.init.xavier_uniform_)
# ---------------------------------------------------------------------------
def xavier_uniform(key, shape, dtype=jnp.float32):
    fan_in, fan_out = shape
    limit = (6.0 / (fan_in + fan_out)) ** 0.5
    return jax.random.uniform(key, shape, dtype, minval=-limit, maxval=limit)


def init_params(key, gae_n_dec_1, gae_n_dec_2, gae_n_dec_3, n_inputs):
    k1, k2, k3 = jax.random.split(key, 3)
    return {
        "w1": xavier_uniform(k1, (gae_n_dec_1, gae_n_dec_2)),
        "w2": xavier_uniform(k2, (gae_n_dec_2, gae_n_dec_3)),
        "w3": xavier_uniform(k3, (gae_n_dec_3, n_inputs)),
    }


# Pure-JAX reference for correctness verification.
def igae_decoder_ref(z_igae, adj, params):
    z = adj @ jnp.tanh(z_igae @ params["w1"])
    z = adj @ jnp.tanh(z @ params["w2"])
    z = adj @ jnp.tanh(z @ params["w3"])
    adj_hat = jax.nn.sigmoid(z @ z.T)
    return z, adj_hat


if __name__ == "__main__":
    master_key = jax.random.PRNGKey(0)

    def make_inputs(key, n, f_in):
        k_z, k_adj = jax.random.split(key)
        z = jax.random.normal(k_z, (n, f_in), jnp.float32)
        # Symmetric, row-normalized dense adjacency (torch.spmm(adj, x) == adj @ x).
        a = jax.random.uniform(k_adj, (n, n), jnp.float32)
        a = (a + a.T) * 0.5 + jnp.eye(n, dtype=jnp.float32)
        adj = a / jnp.sum(a, axis=1, keepdims=True)
        return z, adj

    def check(key, n, d1, d2, d3, n_in, *, bf16_matmul, atol, rtol):
        k_in, k_p = jax.random.split(key)
        z_igae, adj = make_inputs(k_in, n, d1)
        params = init_params(k_p, d1, d2, d3, n_in)
        z_out, adj_hat = igae_decoder_forward(z_igae, adj, params,
                                              bf16_matmul=bf16_matmul)
        jax.block_until_ready((z_out, adj_hat))
        z_ref, a_ref = igae_decoder_ref(z_igae, adj, params)
        assert z_out.shape == (n, n_in)
        assert adj_hat.shape == (n, n)
        assert jnp.allclose(z_out, z_ref, atol=atol, rtol=rtol), "z mismatch"
        assert jnp.allclose(adj_hat, a_ref, atol=atol, rtol=rtol), "adj_hat mismatch"

    k1, k2, k3 = jax.random.split(master_key, 3)

    # 1) Small shapes, default bf16 MXU operands (f32 accumulation).
    check(k1, 64, 32, 64, 32, 48, bf16_matmul=True, atol=5e-2, rtol=5e-2)

    # 2) Same shapes, conservative f32 MXU path, strict tolerance.
    check(k2, 64, 32, 64, 32, 48, bf16_matmul=False, atol=1e-4, rtol=1e-4)

    # 3) Multi-tile case: 3 adj row tiles (exercises streaming + Buffered(3)),
    #    mixed feature widths padded to a common F_p=256, 3x3 adj_hat tiles.
    check(k3, 384, 20, 160, 64, 200, bf16_matmul=False, atol=5e-4, rtol=5e-4)

    print("KERNEL_OK")
</pallas_src>

<mosaic_0001>
module attributes {stable_mosaic.version = 11 : i64} {
  func.func @_gnn_layers_kernel(%arg0: i32, %arg1: i32, %arg2: memref<128x128xf32, #tpu.memory_space<vmem>>, %arg3: memref<1x128x128xbf16, #tpu.memory_space<vmem>>, %arg4: memref<128x128xbf16, #tpu.memory_space<vmem>>, %arg5: memref<128x128xf32, #tpu.memory_space<vmem>>, %arg6: memref<128x128xbf16, #tpu.memory_space<vmem>>) attributes {dimension_semantics = [#tpu.dimension_semantics<arbitrary>, #tpu.dimension_semantics<arbitrary>], iteration_bounds = array<i64: 3, 1>, scalar_prefetch = 0 : i64, scratch_operands = 1 : i64, tpu.core_type = #tpu.core_type<tc>, window_params = [{pipeline_mode = #tpu.pipeline_mode<synchronous>, transform_indices = @transform_0, window_bounds = array<i64: 128, 128>}, {transform_indices = @transform_1, window_bounds = array<i64: 1, 128, 128>}, {transform_indices = @transform_2, window_bounds = array<i64: 128, 128>}, {pipeline_mode = #tpu.pipeline_mode<synchronous>, transform_indices = @transform_3, window_bounds = array<i64: 128, 128>}]} {
    %c0_i32 = arith.constant 0 : i32
    %0 = arith.cmpi eq, %arg0, %c0_i32 : i32
    %c0_i32_0 = arith.constant 0 : i32
    %1 = arith.cmpi eq, %arg1, %c0_i32_0 : i32
    %2 = arith.andi %0, %1 : i1
    %3 = arith.extui %2 : i1 to i32
    %c0_i32_1 = arith.constant 0 : i32
    %4 = arith.cmpi ne, %3, %c0_i32_1 : i32
    scf.if %4 {
      %c0_8 = arith.constant 0 : index
      %c0_9 = arith.constant 0 : index
      %15 = vector.load %arg2[%c0_8, %c0_9] : memref<128x128xf32, #tpu.memory_space<vmem>>, vector<128x128xf32>
      %c0_10 = arith.constant 0 : index
      %c0_11 = arith.constant 0 : index
      %16 = vector.load %arg5[%c0_10, %c0_11] : memref<128x128xf32, #tpu.memory_space<vmem>>, vector<128x128xf32>
      tpu.vector_store %arg5[%c0_10, %c0_11], %15 {strides = array<i32>} : memref<128x128xf32, #tpu.memory_space<vmem>>, vector<128x128xf32>,
    } else {
    }
    %c0_i32_2 = arith.constant 0 : i32
    %5 = arith.cmpi eq, %arg1, %c0_i32_2 : i32
    %6 = arith.extui %5 : i1 to i32
    %c0_i32_3 = arith.constant 0 : i32
    %7 = arith.cmpi ne, %6, %c0_i32_3 : i32
    scf.if %7 {
      %c0_8 = arith.constant 0 : index
      %c0_9 = arith.constant 0 : index
      %15 = vector.load %arg5[%c0_8, %c0_9] : memref<128x128xf32, #tpu.memory_space<vmem>>, vector<128x128xf32>
      %16 = arith.truncf %15 : vector<128x128xf32> to vector<128x128xbf16>
      %c0_10 = arith.constant 0 : index
      %c0_11 = arith.constant 0 : index
      %c0_12 = arith.constant 0 : index
      %17 = vector.load %arg3[%c0_10, %c0_11, %c0_12] : memref<1x128x128xbf16, #tpu.memory_space<vmem>>, vector<1x128x128xbf16>
      %18 = vector.shape_cast %17 : vector<1x128x128xbf16> to vector<128x128xbf16>
      %cst_13 = arith.constant dense<0.000000e+00> : vector<128x128xf32>
      %19 = tpu.matmul %16, %18, %cst_13 {dimension_numbers = #tpu.dot_dimension_numbers<[1], [0], [0], [1], [0, 0, 1, 1], [], []>} : vector<128x128xbf16>, vector<128x128xbf16>, vector<128x128xf32> -> vector<128x128xf32>
      %20 = math.tanh %19 : vector<128x128xf32>
      %21 = arith.truncf %20 : vector<128x128xf32> to vector<128x128xbf16>
      %c0_14 = arith.constant 0 : index
      %c0_15 = arith.constant 0 : index
      %22 = vector.load %arg6[%c0_14, %c0_15] : memref<128x128xbf16, #tpu.memory_space<vmem>>, vector<128x128xbf16>
      tpu.vector_store %arg6[%c0_14, %c0_15], %21 {strides = array<i32>} : memref<128x128xbf16, #tpu.memory_space<vmem>>, vector<128x128xbf16>,
    } else {
    }
    %c0 = arith.constant 0 : index
    %c0_4 = arith.constant 0 : index
    %8 = vector.load %arg4[%c0, %c0_4] : memref<128x128xbf16, #tpu.memory_space<vmem>>, vector<128x128xbf16>
    %c0_5 = arith.constant 0 : index
    %c0_6 = arith.constant 0 : index
    %9 = vector.load %arg6[%c0_5, %c0_6] : memref<128x128xbf16, #tpu.memory_space<vmem>>, vector<128x128xbf16>
    %cst = arith.constant dense<0.000000e+00> : vector<128x128xf32>
    %10 = tpu.matmul %8, %9, %cst {dimension_numbers = #tpu.dot_dimension_numbers<[1], [0], [0], [1], [0, 0, 1, 1], [], []>} : vector<128x128xbf16>, vector<128x128xbf16>, vector<128x128xf32> -> vector<128x128xf32>
    %c128_i32 = arith.constant 128 : i32
    %11 = arith.muli %arg1, %c128_i32 : i32
    %12 = tpu.assume_multiple %11, 128 : i32
    %13 = arith.index_cast %12 : i32 to index
    %c0_7 = arith.constant 0 : index
    %14 = vector.load %arg5[%13, %c0_7] : memref<128x128xf32, #tpu.memory_space<vmem>>, vector<128x128xf32>
    tpu.vector_store %arg5[%13, %c0_7], %10 {strides = array<i32>} : memref<128x128xf32, #tpu.memory_space<vmem>>, vector<128x128xf32>,
    return
  }
  func.func @transform_0(%arg0: i32, %arg1: i32) -> (i32, i32) {
    %c0_i32 = arith.constant 0 : i32
    %c0_i32_0 = arith.constant 0 : i32
    %c0_i32_1 = arith.constant 0 : i32
    return %c0_i32, %c0_i32_0 : i32, i32
  }
  func.func @transform_1(%arg0: i32, %arg1: i32) -> (i32, i32, i32) {
    %c0_i32 = arith.constant 0 : i32
    %c0_i32_0 = arith.constant 0 : i32
    %c0_i32_1 = arith.constant 0 : i32
    return %arg0, %c0_i32, %c0_i32_0 : i32, i32, i32
  }
  func.func @transform_2(%arg0: i32, %arg1: i32) -> (i32, i32) {
    %c0_i32 = arith.constant 0 : i32
    %c0_i32_0 = arith.constant 0 : i32
    return %arg1, %c0_i32 : i32, i32
  }
  func.func @transform_3(%arg0: i32, %arg1: i32) -> (i32, i32) {
    %c0_i32 = arith.constant 0 : i32
    %c0_i32_0 = arith.constant 0 : i32
    %c0_i32_1 = arith.constant 0 : i32
    return %c0_i32, %c0_i32_0 : i32, i32
  }
}

</mosaic_0001>

<bundles_post_ra>
// kernel: tpu_custom_call.1
= control target key start
LH: loop header
LB: loop body
LE: loop exit
PB: predicated region body
PF: predicated region fallthrough
CT: control target
= control target key end

     0   :  { %8 = vsyncpa [#allocation4], 0  ;;  %s1472_s0 = inlined_call_operand.hbm [shape: f32[128,128], index: 0, kind: input, shape index: {}]   ;;  %s1473_s1 = inlined_call_operand.hbm [shape: bf16[3,128,128], index: 1, kind: input, shape index: {}]   ;;  %s1474_s2 = inlined_call_operand.hbm [shape: bf16[128,128], index: 2, kind: input, shape index: {}]   ;;  %s1475_s3 = inlined_call_operand.hbm [shape: f32[128,128], index: 3, kind: output, shape index: {}]  }
   0x1   :  { %9 = vsyncpa [#allocation7], 0 }
   0x2   :  { %11 = vsyncpa [#allocation7 + $0x1], 0 }
   0x3   :  { %12 = vsyncpa [#allocation5], 0  ;;  %s1240_s12 = smov 0   ;;  %s1242_s13 = smov 0  }
   0x4   :  { %s1244_s14 = smov 0   ;;  %s1246_s15 = smov 0  }
   0x5   :  { %s1248_s16 = smov 0   ;;  %s1250_s17 = smov 0  }
   0x6 LB: > { %s1269_s18 = sadd.s32 4294967295, %s1208_s17   ;;  %p65_p0 = scmp.ne.s32.totalorder %s1196_s14, %s1192_s13  ;;  %s1208_s17 = sphi %s1250_s17, %s18_s17   ;;  %s1204_s16 = sphi %s1248_s16, %s1497_s16   ;;  %s1200_s15 = sphi %s1246_s15, %s1496_s15   ;;  %s1196_s14 = sphi %s1244_s14, %s1495_s14   ;;  %s1192_s13 = sphi %s1242_s13, %s1494_s13   ;;  %s1188_s12 = sphi %s1240_s12, %s1493_s12  }
   0x7   : > { %p66_p1 = scmp.eq.s32.totalorder %s1208_s17, 0  ;;  %p71_p2 = scmp.ne.s32.totalorder %s1192_s13, %s1188_s12 }
   0x8   : > { %p1476_p3 = scmp.eq.s32.totalorder %s1269_s18, 0  ;;  %p767_p4 = scmp.ge.s32.totalorder %s1208_s17, 1 }
   0x9   : > { %p67_p5 = por %p66_p1, %p65_p0  ;;  %p129_p6 = scmp.lt.s32.totalorder %s1208_s17, 4 }
   0xa   : > { %p1280_p7 = por %p1476_p3, %p71_p2  ;;  %s1210_s21 = smov [#allocation8]  }
   0xb   : > { %p1284_p8 = pnand %p767_p4, %p129_p6  ;;  %s157_s22 = sshll.u32 %s1210_s21, 4  ;;  %s158_s22 = int_to_ptr.vmem [resolvable:$true] %s157_s22 }
   0xc   : > { %s1480_s19 = scalar_select %p1280_p7, 1, 0 }
   0xd   : > { %s1481_s20 = scalar_select %p1284_p8, 1, 0 }
   0xe   : > { %p911_p9 = pneg %p1284_p8  ;;  %p924_p11 = scmp.lt.s32.totalorder %s1208_s17, 3 }
   0xf   : > { %s1034_s27 = scalar_lea.hbm %s1474_s2, 1024 }
  0x10   : > { %p1292_p10 = pnand %p911_p9, %p1476_p3  ;;  %p1297_p12 = pnand %p924_p11, %p67_p5 }
  0x11   : > { %p1035_p13 = scmp.ne.s32.totalorder %s1474_s2, %s1034_s27  ;;  %p1041_p4 = scmp.lt.u32.totalorder %s1034_s27, %s1474_s2 }
  0x12   : > { %s1483_s24 = scalar_select %p1297_p12, 1, 0 }
  0x13   : > { %p1036_p0 = pneg %p1292_p10 }
  0x15   : > { %p1037_p1 = pnand %p1036_p0, %p1035_p13 }
  0x17   : > { %p1038_p2 = pneg %p1037_p1 }
  0x19   : > { %p1043_p5 = pnand %p1041_p4, %p1038_p2 }
  0x1b   : > { %1046 = shalt.err (!%p1043_p5)
}
  0x1c   : > { %s1047_s5 = scalar_lea.vmem %s158_s22, 1024  ;;  %p1055_p3 = scmp.lt.s32.totalorder %s158_s22, %s158_s22 }
  0x1d   : > { %p1048_p6 = scmp.ne.s32.totalorder %s158_s22, %s1047_s5  ;;  %p1056_p7 = scmp.lt.s32.totalorder %s1047_s5, %s1047_s5 }
  0x1f   : > { %p1050_p9 = pnand %p1048_p6, %p1036_p0  ;;  %p1057_p8 = por %p1056_p7, %p1055_p3 }
  0x21   : > { %p1051_p11 = pneg %p1050_p9 }
  0x23   : > { %p1058_p12 = pnand %p1057_p8, %p1051_p11 }
  0x25   : > { %1061 = shalt.err (!%p1058_p12)
}
  0x26   : > { %s1211_s6 = smov 64   ;;  %s1212_s7 = smov 4  }
  0x27   : > { %917 = dma.hbm_to_vmem [thread:$0]  (!%p1292_p10), %s1474_s2, 1024, %s158_s22, [#allocation7], %s1211_s6, %s1211_s6, %s1212_s7  }
  0x28   : > { %s1213_s10 = smov [#allocation3]   ;;  %s1062_s25 = scalar_lea.hbm %s1472_s0, 2048 }
  0x29   : > { %s141_s11 = sshll.u32 %s1213_s10, 4  ;;  %p1063_p3 = scmp.ne.s32.totalorder %s1472_s0, %s1062_s25  ;;  %s142_s11 = int_to_ptr.vmem [resolvable:$true] %s141_s11 }
  0x2a   : > { %p1069_p12 = scmp.lt.u32.totalorder %s1062_s25, %s1472_s0 }
  0x2b   : > { %p1065_p7 = pnand %p1063_p3, %p1036_p0 }
  0x2d   : > { %p1066_p8 = pneg %p1065_p7 }
  0x2f   : > { %p1071_p13 = pnand %p1069_p12, %p1066_p8 }
  0x31   : > { %1074 = shalt.err (!%p1071_p13)
}
  0x32   : > { %s1075_s22 = scalar_lea.vmem %s142_s11, 2048  ;;  %p1083_p5 = scmp.lt.s32.totalorder %s142_s11, %s142_s11 }
  0x33   : > { %p1076_p1 = scmp.ne.s32.totalorder %s142_s11, %s1075_s22  ;;  %p1084_p6 = scmp.lt.s32.totalorder %s1075_s22, %s1075_s22 }
  0x35   : > { %p1078_p2 = pnand %p1076_p1, %p1036_p0  ;;  %p1085_p9 = por %p1084_p6, %p1083_p5 }
  0x37   : > { %p1079_p4 = pneg %p1078_p2 }
  0x39   : > { %p1086_p11 = pnand %p1085_p9, %p1079_p4 }
  0x3b   : > { %1089 = shalt.err (!%p1086_p11)
}
  0x3c   : > { %s1214_s30 = smov 128   ;;  %s1215_s4 = smov 8  }
  0x3d   : > { %914 = dma.hbm_to_vmem [thread:$0]  (!%p1292_p10), %s1472_s0, 2048, %s142_s11, [#allocation4], %s1214_s30, %s1214_s30, %s1215_s4  }
  0x3e   : > { %s58_s9 = sadd.s32 1, %s1196_s14  ;;  %s171_s10 = sand.u32 1, %s1208_s17  }
  0x3f   : > { %s30_s12 = sadd.s32 1, %s1204_s16  ;;  %s173_s21 = sand.u32 1, %s1196_s14  }
  0x40   : > { %p32_p0 = scmp.ge.s32.totalorder %s30_s12, 3  ;;  %s771_s25 = sshll.u32 %s173_s21, 6 }
  0x41   : > { %s799_s26 = sshll.u32 %s1204_s16, 10  ;;  %s175_s29 = scalar_lea.vmem [#allocation6], %s771_s25 }
  0x42   : > { %s1499_s12 = smov (%p32_p0, %s30_s12), 0  ;;  %s1356_s23 = scalar_lea.hbm %s1473_s1, %s799_s26 }
  0x43   : > { %s55_s11 = ssub.s32 %s1204_s16, %s1499_s12  ;;  %s182_s22 = sshll.u32 %s175_s29, 4  ;;  %s1364_s22 = int_to_ptr.vmem [resolvable:$true] %s182_s22 }
  0x44   : > { %p1360_p10 = scmp.eq.s32.totalorder %s55_s11, 0  ;;  %s1366_s4 = scalar_lea.sflag [#allocation7], %s171_s10 }
  0x45   : > { %s1090_s5 = scalar_lea.hbm %s1356_s23, 1024  ;;  %p1485_p7 = scmp.ne.s32.totalorder %s1483_s24, 0 }
  0x46   : > { %p1091_p3 = scmp.ne.s32.totalorder %s1356_s23, %s1090_s5  ;;  %s1095_s25 = scalar_lea.hbm %s1473_s1, 3072 }
  0x47   : > { %p1092_p8 = pneg %p1485_p7  ;;  %p1096_p1 = scmp.lt.u32.totalorder %s1356_s23, %s1473_s1 }
  0x48   : > { %p1097_p2 = scmp.lt.u32.totalorder %s1095_s25, %s1090_s5  ;;  %p1099_p5 = scmp.lt.u32.totalorder %s1090_s5, %s1356_s23 }
  0x49   : > { %p1093_p12 = pnand %p1092_p8, %p1091_p3 }
  0x4a   : > { %p1098_p4 = por %p1097_p2, %p1096_p1 }
  0x4b   : > { %p1094_p13 = pneg %p1093_p12 }
  0x4c   : > { %p1100_p6 = por %p1099_p5, %p1098_p4 }
  0x4e   : > { %p1101_p9 = pnand %p1100_p6, %p1094_p13 }
  0x50   : > { %1104 = shalt.err (!%p1101_p9)
}
  0x51   : > { %s1105_s10 = scalar_lea.vmem %s1364_s22, 1024  ;;  %s1216_s28 = smov [#allocation6]  }
  0x52   : > { %p1106_p11 = scmp.ne.s32.totalorder %s1364_s22, %s1105_s10  ;;  %s1110_s11 = sshll.u32 %s1216_s28, 4  ;;  %s1111_s11 = int_to_ptr.vmem [resolvable:$false] %s1110_s11 }
  0x53   : > { %s1112_s29 = scalar_lea.vmem %s1111_s11, 2048  ;;  %p1113_p12 = scmp.lt.s32.totalorder %s1364_s22, %s1111_s11 }
  0x54   : > { %p1108_p0 = pnand %p1106_p11, %p1092_p8  ;;  %p1114_p1 = scmp.lt.s32.totalorder %s1112_s29, %s1105_s10 }
  0x56   : > { %p1109_p3 = pneg %p1108_p0  ;;  %p1115_p2 = por %p1114_p1, %p1113_p12 }
  0x58   : > { %p1116_p4 = pnand %p1115_p2, %p1109_p3 }
  0x5a   : > { %1119 = shalt.err (!%p1116_p4)
}
  0x5b   : > { %921 = dma.hbm_to_vmem [thread:$0]  (!%p1485_p7), %s1356_s23, 1024, %s1364_s22, %s1366_s4, %s1211_s6, %s1211_s6, %s1212_s7  }
  0x5c   : > { %s1402_s5 = scalar_select %p1360_p10, %s1196_s14, %s58_s9  }
  0x5d   : > { %p1486_p8 = scmp.ne.s32.totalorder %s1481_s20, 0 }
  0x5e   : > { %p1487_p13 = scmp.eq.s32.totalorder (!%p1486_p8), %s1269_s18, 0 }
  0x5f   : > { %194 = sbr.rel (%p1486_p8) target bundleno = 669 (0x29d), region = 32 }
  0x66   : > { %1171 = dma.done.wait (%p1487_p13), [#allocation4], 2048   ;;  %p1488_p5 = pmov %p1487_p13 }
  0x67   : > { %s200_s24 = sand.u32 1, %s1269_s18   ;;  %s202_s8 = sand.u32 1, %s1192_s13  }
  0x68   : > { %1173 = vsyncadd (%p1488_p5), [#allocation4], 4294965248  ;;  %s776_s21 = sshll.u32 %s202_s8, 6  ;;  %s201_s6 = scalar_lea.sflag [#allocation7], %s200_s24 }
  0x69   : > { %s1412_s7 = scalar_lea.vmem [#allocation6], %s776_s21  ;;  %p1489_p10 = scmp.ne.s32.totalorder %s1480_s19, 0 }
  0x6b   : > { %1175 = dma.done.wait (%p1489_p10), %s201_s6, 1024  }
  0x6c   : > { %1177 = vsyncadd (%p1489_p10), %s201_s6, 4294966272  ;;  %p1490_p7 = pmov %p1488_p5 }
  0x6d   : > { %p1491_p6 = pmov %p1488_p5 }
  0x6e   : > { %1179 = dma.done.wait (%p1490_p7), [#allocation7], 1024  }
  0x6f   : > { %1181 = vsyncadd (%p1491_p6), [#allocation7], 4294966272  ;;  %p228_p9 = scmp.eq.s32.totalorder %s1200_s15, 0 }
  0x70   : > { %v234_v0 = vld [vmem:[#allocation3] sm:$0xff] (%p228_p9)  ;;  %v235_v1 = vld [vmem:[#allocation3 + $0x8] sm:$0xff] (%p228_p9)  ;;  %v236_v2 = vld [vmem:[#allocation3 + $0x10] sm:$0xff] (%p228_p9) }
  0x71   : > { %233 = sbr.rel (!%p228_p9) target bundleno = 121 (0x79), region = 48  ;;  %250 = vst [vmem:[#allocation9] sm:$0xff] (%p228_p9), %v234_v0  ;;  %251 = vst [vmem:[#allocation9 + $0x8] sm:$0xff] (%p228_p9), %v235_v1  ;;  %v237_v3 = vld [vmem:[#allocation3 + $0x18] sm:$0xff] (%p228_p9)  ;;  %v238_v4 = vld [vmem:[#allocation3 + $0x20] sm:$0xff] (%p228_p9) }
  0x72   : > { %252 = vst [vmem:[#allocation9 + $0x10] sm:$0xff] (%p228_p9), %v236_v2  ;;  %v239_v5 = vld [vmem:[#allocation3 + $0x28] sm:$0xff] (%p228_p9)  ;;  %253 = vst [vmem:[#allocation9 + $0x18] sm:$0xff] (%p228_p9), %v237_v3  ;;  %v240_v6 = vld [vmem:[#allocation3 + $0x30] sm:$0xff] (%p228_p9) }
  0x73   : > { %254 = vst [vmem:[#allocation9 + $0x20] sm:$0xff] (%p228_p9), %v238_v4  ;;  %255 = vst [vmem:[#allocation9 + $0x28] sm:$0xff] (%p228_p9), %v239_v5  ;;  %v241_v7 = vld [vmem:[#allocation3 + $0x38] sm:$0xff] (%p228_p9)  ;;  %v242_v8 = vld [vmem:[#allocation3 + $0x40] sm:$0xff] (%p228_p9) }
  0x74   : > { %256 = vst [vmem:[#allocation9 + $0x30] sm:$0xff] (%p228_p9), %v240_v6  ;;  %257 = vst [vmem:[#allocation9 + $0x38] sm:$0xff] (%p228_p9), %v241_v7  ;;  %v243_v9 = vld [vmem:[#allocation3 + $0x48] sm:$0xff] (%p228_p9)  ;;  %v244_v10 = vld [vmem:[#allocation3 + $0x50] sm:$0xff] (%p228_p9) }
  0x75   : > { %258 = vst [vmem:[#allocation9 + $0x40] sm:$0xff] (%p228_p9), %v242_v8  ;;  %v245_v11 = vld [vmem:[#allocation3 + $0x58] sm:$0xff] (%p228_p9)  ;;  %259 = vst [vmem:[#allocation9 + $0x48] sm:$0xff] (%p228_p9), %v243_v9  ;;  %v246_v12 = vld [vmem:[#allocation3 + $0x60] sm:$0xff] (%p228_p9) }
  0x76   : > { %260 = vst [vmem:[#allocation9 + $0x50] sm:$0xff] (%p228_p9), %v244_v10  ;;  %261 = vst [vmem:[#allocation9 + $0x58] sm:$0xff] (%p228_p9), %v245_v11  ;;  %v247_v13 = vld [vmem:[#allocation3 + $0x68] sm:$0xff] (%p228_p9)  ;;  %v248_v14 = vld [vmem:[#allocation3 + $0x70] sm:$0xff] (%p228_p9) }
  0x77   : > { %262 = vst [vmem:[#allocation9 + $0x60] sm:$0xff] (%p228_p9), %v246_v12  ;;  %263 = vst [vmem:[#allocation9 + $0x68] sm:$0xff] (%p228_p9), %v247_v13  ;;  %v249_v15 = vld [vmem:[#allocation3 + $0x78] sm:$0xff] (%p228_p9) }
  0x78   : > { %264 = vst [vmem:[#allocation9 + $0x70] sm:$0xff] %v248_v14  ;;  %265 = vst [vmem:[#allocation9 + $0x78] sm:$0xff] %v249_v15 }
  0x79 PF: > { %v986_v16 = vld [vmem:[%s1412_s7] sm:$0xff]   ;;  %v987_v17 = vld [vmem:[%s1412_s7 + $0x8] sm:$0xff]   ;;  %v988_v18 = vld [vmem:[%s1412_s7 + $0x10] sm:$0xff]   ;;  %s1217_s15 = smov [#allocation9]   ;;  %p927_p11 = scmp.eq.s32.totalorder %s1269_s18, 2 }
  0x7a   : > { %833 = vmatprep.subr.bf16.mxu0 %v986_v16  ;;  %v989_v19 = vld [vmem:[%s1412_s7 + $0x18] sm:$0xff]   ;;  %v269_v20 = vld [vmem:[#allocation9] sm:$0xff]  ;;  %v270_v21 = vld [vmem:[#allocation9 + $0x8] sm:$0xff]  ;;  %s679_s19 = sshll.u32 %s1217_s15, 4  ;;  %s680_s19 = int_to_ptr.vmem [resolvable:$true] %s679_s19 }
  0x7b   : > { %834 = vmatpush3.bf16.msra.mxu0 %v986_v16  ;;  %v285_v22 = vpack.c.bf16 %v270_v21, %v269_v20  ;;  %v990_v23 = vld [vmem:[%s1412_s7 + $0x20] sm:$0xff]   ;;  %v991_v24 = vld [vmem:[%s1412_s7 + $0x28] sm:$0xff]   ;;  %v992_v25 = vld [vmem:[%s1412_s7 + $0x30] sm:$0xff]   ;;  %s1120_s20 = scalar_lea.vmem %s680_s19, 2048  ;;  %p1127_p1 = scmp.lt.s32.totalorder %s680_s19, %s680_s19 }
  0x7c   : > { %835 = vmatprep.subr.bf16.mxu0 %v987_v17  ;;  %v993_v26 = vld [vmem:[%s1412_s7 + $0x38] sm:$0xff]   ;;  %v271_v27 = vld [vmem:[#allocation9 + $0x10] sm:$0xff]  ;;  %v273_v29 = vld [vmem:[#allocation9 + $0x20] sm:$0xff]  ;;  %p1121_p0 = scmp.ne.s32.totalorder %s680_s19, %s1120_s20  ;;  %p1128_p2 = scmp.lt.s32.totalorder %s1120_s20, %s1120_s20 }
  0x7d   : > { %849 = vmatprep.mubr.bf16.mxu0 %v285_v22  ;;  %v272_v28 = vld [vmem:[#allocation9 + $0x18] sm:$0xff]  ;;  %v274_v30 = vld [vmem:[#allocation9 + $0x28] sm:$0xff]  ;;  %v275_v33 = vld [vmem:[#allocation9 + $0x30] sm:$0xff] }
  0x7e   : > { %v286_v31 = vpack.c.bf16 %v272_v28, %v271_v27  ;;  %v287_v32 = vpack.c.bf16 %v274_v30, %v273_v29  ;;  %v276_v34 = vld [vmem:[#allocation9 + $0x38] sm:$0xff]  ;;  %v277_v35 = vld [vmem:[#allocation9 + $0x40] sm:$0xff]  ;;  %v278_v36 = vld [vmem:[#allocation9 + $0x48] sm:$0xff]  ;;  %p1122_p3 = pnand %p1121_p0, %p927_p11  ;;  %p1129_p4 = por %p1128_p2, %p1127_p1 }
  0x7f   : > { %836 = vmatpush3.bf16.msra.mxu0 %v987_v17  ;;  %v288_v37 = vpack.c.bf16 %v276_v34, %v275_v33  ;;  %v289_v38 = vpack.c.bf16 %v278_v36, %v277_v35  ;;  %v279_v39 = vld [vmem:[#allocation9 + $0x50] sm:$0xff]  ;;  %v280_v40 = vld [vmem:[#allocation9 + $0x58] sm:$0xff]  ;;  %v281_v41 = vld [vmem:[#allocation9 + $0x60] sm:$0xff] }
  0x80   : > { %837 = vmatprep.subr.bf16.mxu0 %v988_v18  ;;  %v282_v42 = vld [vmem:[#allocation9 + $0x68] sm:$0xff]  ;;  %v290_v43 = vpack.c.bf16 %v280_v40, %v279_v39  ;;  %v283_v45 = vld [vmem:[#allocation9 + $0x70] sm:$0xff]  ;;  %v284_v46 = vld [vmem:[#allocation9 + $0x78] sm:$0xff]  ;;  %p1123_p12 = pneg %p1122_p3 }
  0x81   : > { %v291_v44 = vpack.c.bf16 %v282_v42, %v281_v41  ;;  %v292_v47 = vpack.c.bf16 %v284_v46, %v283_v45  ;;  %v994_v48 = vld [vmem:[#allocation8] sm:$0xff]   ;;  %v997_v27 = vld [vmem:[#allocation8 + $0x18] sm:$0xff]   ;;  %v999_v29 = vld [vmem:[#allocation8 + $0x28] sm:$0xff]  }
  0x82   : > { %881 = vmatprep.mubr.bf16.mxu1 %v994_v48  ;;  %v998_v28 = vld [vmem:[#allocation8 + $0x20] sm:$0xff]   ;;  %v1000_v30 = vld [vmem:[#allocation8 + $0x30] sm:$0xff]   ;;  %p1130_p8 = pnand %p1129_p4, %p1123_p12 }
  0x83   : > { %838 = vmatpush3.bf16.msra.mxu0 %v988_v18 }
  0x84   : > { %839 = vmatprep.subr.bf16.mxu0 %v989_v19 }
  0x87   : > { %840 = vmatpush3.bf16.msra.mxu0 %v989_v19 }
  0x88   : > { %841 = vmatprep.subr.bf16.mxu0 %v990_v23 }
  0x8b   : > { %842 = vmatpush3.bf16.msra.mxu0 %v990_v23 }
  0x8c   : > { %843 = vmatprep.subr.bf16.mxu0 %v991_v24 }
  0x8f   : > { %844 = vmatpush3.bf16.msra.mxu0 %v991_v24 }
  0x90   : > { %845 = vmatprep.subr.bf16.mxu0 %v992_v25 }
  0x93   : > { %846 = vmatpush3.bf16.msra.mxu0 %v992_v25  ;;  %v995_v25 = vld [vmem:[#allocation8 + $0x8] sm:$0xff]  }
  0x94   : > { %847 = vmatprep.subr.bf16.mxu0 %v993_v26 }
  0x97   : > { %848 = vmatpush3.bf16.msra.mxu0 %v993_v26  ;;  %v996_v26 = vld [vmem:[#allocation8 + $0x10] sm:$0xff]  }
  0x9a   : > { %850 = vmatmul.mubr.bf16.vlgmr.msra.gmra.mrb[0].mxu0 %v286_v31  ;;  %v1001_v31 = vld [vmem:[#allocation8 + $0x38] sm:$0xff]  }
  0x9b   : > { %853 = vmatprep.mubr.bf16.mxu0 %v287_v32 }
  0xa2   : > { %854 = vmatmul.mubr.bf16.gmra.mrb[4].mxu0 %v288_v37 }
  0xa3   : > { %857 = vmatprep.mubr.bf16.mxu0 %v289_v38 }
  0xaa   : > { %858 = vmatmul.mubr.bf16.gmra.mrb[8].mxu0 %v290_v43 }
  0xab   : > { %861 = vmatprep.mubr.bf16.mxu0 %v291_v44 }
  0xb2   : > { %862 = vmatmul.mubr.bf16.gmra.mrb[12].mxu0 %v292_v47 }
 0x16d   : > { %v851_v49 = vpop.f32.mrb[0].mxu0 }
 0x16e   : > { %1002 = vtanh.f32 %v851_v49  ;;  %v391_v50 = vpop.f32.mrb[1].mxu0 }
 0x16f   : > { %1004 = vtanh.f32 %v391_v50  ;;  %v852_v51 = vpop.f32.mrb[2].mxu0 }
 0x170   : > { %1006 = vtanh.f32 %v852_v51  ;;  %v394_v52 = vpop.f32.mrb[3].mxu0 }
 0x171   : > { %1008 = vtanh.f32 %v394_v52 }
 0x175   : > { %v855_v53 = vpop.f32.mrb[4].mxu0 }
 0x176   : > { %1010 = vtanh.f32 %v855_v53  ;;  %v407_v54 = vpop.f32.mrb[5].mxu0 }
 0x177   : > { %1012 = vtanh.f32 %v407_v54  ;;  %v856_v55 = vpop.f32.mrb[6].mxu0 }
 0x178   : > { %v1003_v56 = vpop.eup %1002  ;;  %1014 = vtanh.f32 %v856_v55  ;;  %v410_v57 = vpop.f32.mrb[7].mxu0 }
 0x179   : > { %v1005_v58 = vpop.eup %1004  ;;  %1016 = vtanh.f32 %v410_v57 }
 0x17a   : > { %v1007_v59 = vpop.eup %1006 }
 0x17b   : > { %v1009_v60 = vpop.eup %1008  ;;  %v471_v61 = vpack.c.bf16 %v1007_v59, %v1003_v56 }
 0x17c   : > { %v470_v62 = vpack.c.bf16 %v1009_v60, %v1005_v58 }
 0x17d   : > { %v859_v63 = vpop.f32.mrb[8].mxu0 }
 0x17e   : > { %1018 = vtanh.f32 %v859_v63  ;;  %v423_v0 = vpop.f32.mrb[9].mxu0  ;;  %865 = vmatprep.subr.bf16.mxu1 %v470_v62 }
 0x17f   : > { %1020 = vtanh.f32 %v423_v0  ;;  %v860_v1 = vpop.f32.mrb[10].mxu0  ;;  %866 = vmatpush3.bf16.msra.mxu1 %v470_v62 }
 0x180   : > { %v1011_v2 = vpop.eup %1010  ;;  %1022 = vtanh.f32 %v860_v1  ;;  %v426_v3 = vpop.f32.mrb[11].mxu0  ;;  %867 = vmatprep.subr.bf16.mxu1 %v471_v61 }
 0x181   : > { %v1013_v4 = vpop.eup %1012  ;;  %1024 = vtanh.f32 %v426_v3 }
 0x182   : > { %v1015_v5 = vpop.eup %1014 }
 0x183   : > { %v1017_v6 = vpop.eup %1016  ;;  %868 = vmatpush3.bf16.msra.mxu1 %v471_v61  ;;  %v473_v7 = vpack.c.bf16 %v1015_v5, %v1011_v2 }
 0x184   : > { %v472_v8 = vpack.c.bf16 %v1017_v6, %v1013_v4 }
 0x185   : > { %v863_v9 = vpop.f32.mrb[12].mxu0 }
 0x186   : > { %1026 = vtanh.f32 %v863_v9  ;;  %v439_v10 = vpop.f32.mrb[13].mxu0  ;;  %869 = vmatprep.subr.bf16.mxu1 %v472_v8 }
 0x187   : > { %1028 = vtanh.f32 %v439_v10  ;;  %v864_v11 = vpop.f32.mrb[14].mxu0  ;;  %870 = vmatpush3.bf16.msra.mxu1 %v472_v8 }
 0x188   : > { %v1019_v12 = vpop.eup %1018  ;;  %1030 = vtanh.f32 %v864_v11  ;;  %v442_v13 = vpop.f32.mrb[15].mxu0  ;;  %871 = vmatprep.subr.bf16.mxu1 %v473_v7 }
 0x189   : > { %v1021_v14 = vpop.eup %1020  ;;  %1032 = vtanh.f32 %v442_v13 }
 0x18a   : > { %v1023_v15 = vpop.eup %1022 }
 0x18b   : > { %v1025_v16 = vpop.eup %1024  ;;  %872 = vmatpush3.bf16.msra.mxu1 %v473_v7  ;;  %v475_v17 = vpack.c.bf16 %v1023_v15, %v1019_v12 }
 0x18c   : > { %v474_v18 = vpack.c.bf16 %v1025_v16, %v1021_v14 }
 0x18e   : > { %873 = vmatprep.subr.bf16.mxu1 %v474_v18 }
 0x18f   : > { %874 = vmatpush3.bf16.msra.mxu1 %v474_v18 }
 0x190   : > { %v1027_v19 = vpop.eup %1026  ;;  %875 = vmatprep.subr.bf16.mxu1 %v475_v17 }
 0x191   : > { %v1029_v20 = vpop.eup %1028 }
 0x192   : > { %v1031_v21 = vpop.eup %1030 }
 0x193   : > { %v1033_v22 = vpop.eup %1032  ;;  %876 = vmatpush3.bf16.msra.mxu1 %v475_v17  ;;  %v477_v23 = vpack.c.bf16 %v1031_v21, %v1027_v19 }
 0x194   : > { %v476_v24 = vpack.c.bf16 %v1033_v22, %v1029_v20 }
 0x196   : > { %877 = vmatprep.subr.bf16.mxu1 %v476_v24 }
 0x197   : > { %878 = vmatpush3.bf16.msra.mxu1 %v476_v24 }
 0x198   : > { %879 = vmatprep.subr.bf16.mxu1 %v477_v23 }
 0x19b   : > { %880 = vmatpush3.bf16.msra.mxu1 %v477_v23 }
 0x19e   : > { %882 = vmatmul.mubr.bf16.vlgmr.msra.gmra.mrb[0].mxu1 %v995_v25 }
 0x19f   : > { %885 = vmatprep.mubr.bf16.mxu1 %v996_v26 }
 0x1a6   : > { %886 = vmatmul.mubr.bf16.gmra.mrb[4].mxu1 %v997_v27 }
 0x1a7   : > { %889 = vmatprep.mubr.bf16.mxu1 %v998_v28 }
 0x1ae   : > { %890 = vmatmul.mubr.bf16.gmra.mrb[8].mxu1 %v999_v29 }
 0x1af   : > { %893 = vmatprep.mubr.bf16.mxu1 %v1000_v30 }
 0x1b6   : > { %894 = vmatmul.mubr.bf16.gmra.mrb[12].mxu1 %v1001_v31 }
 0x271   : > { %v883_v32 = vpop.f32.mrb[0].mxu1 }
 0x272   : > { %659 = vst [vmem:[#allocation9 + $0x10] sm:$0xff] %v883_v32  ;;  %v592_v33 = vpop.f32.mrb[1].mxu1 }
 0x273   : > { %657 = vst [vmem:[#allocation9] sm:$0xff] %v592_v33  ;;  %v884_v34 = vpop.f32.mrb[2].mxu1 }
 0x274   : > { %660 = vst [vmem:[#allocation9 + $0x18] sm:$0xff] %v884_v34  ;;  %v595_v35 = vpop.f32.mrb[3].mxu1 }
 0x275   : > { %658 = vst [vmem:[#allocation9 + $0x8] sm:$0xff] %v595_v35 }
 0x279   : > { %v887_v36 = vpop.f32.mrb[4].mxu1 }
 0x27a   : > { %663 = vst [vmem:[#allocation9 + $0x30] sm:$0xff] %v887_v36  ;;  %v608_v37 = vpop.f32.mrb[5].mxu1 }
 0x27b   : > { %661 = vst [vmem:[#allocation9 + $0x20] sm:$0xff] %v608_v37  ;;  %v888_v38 = vpop.f32.mrb[6].mxu1 }
 0x27c   : > { %664 = vst [vmem:[#allocation9 + $0x38] sm:$0xff] %v888_v38  ;;  %v611_v39 = vpop.f32.mrb[7].mxu1 }
 0x27d   : > { %662 = vst [vmem:[#allocation9 + $0x28] sm:$0xff] %v611_v39 }
 0x281   : > { %v891_v40 = vpop.f32.mrb[8].mxu1 }
 0x282   : > { %667 = vst [vmem:[#allocation9 + $0x50] sm:$0xff] %v891_v40  ;;  %v624_v41 = vpop.f32.mrb[9].mxu1 }
 0x283   : > { %665 = vst [vmem:[#allocation9 + $0x40] sm:$0xff] %v624_v41  ;;  %v892_v42 = vpop.f32.mrb[10].mxu1 }
 0x284   : > { %668 = vst [vmem:[#allocation9 + $0x58] sm:$0xff] %v892_v42  ;;  %v627_v43 = vpop.f32.mrb[11].mxu1 }
 0x285   : > { %666 = vst [vmem:[#allocation9 + $0x48] sm:$0xff] %v627_v43 }
 0x289   : > { %v895_v44 = vpop.f32.mrb[12].mxu1 }
 0x28a   : > { %671 = vst [vmem:[#allocation9 + $0x70] sm:$0xff] %v895_v44  ;;  %v640_v45 = vpop.f32.mrb[13].mxu1 }
 0x28b   : > { %669 = vst [vmem:[#allocation9 + $0x60] sm:$0xff] %v640_v45  ;;  %v896_v46 = vpop.f32.mrb[14].mxu1 }
 0x28c   : > { %672 = vst [vmem:[#allocation9 + $0x78] sm:$0xff] %v896_v46  ;;  %v643_v47 = vpop.f32.mrb[15].mxu1 }
 0x28d   : > { %670 = vst [vmem:[#allocation9 + $0x68] sm:$0xff] %v643_v47 }
 0x28e   : > { %1133 = shalt.err (!%p1130_p8)
}
 0x28f   : > { %s1134_s22 = scalar_lea.hbm %s1475_s3, 2048 }
 0x290   : > { %p1135_p13 = scmp.ne.s32.totalorder %s1475_s3, %s1134_s22  ;;  %p1140_p7 = scmp.lt.u32.totalorder %s1134_s22, %s1475_s3 }
 0x292   : > { %p1136_p5 = pnand %p1135_p13, %p927_p11 }
 0x294   : > { %p1137_p10 = pneg %p1136_p5 }
 0x296   : > { %p1142_p6 = pnand %p1140_p7, %p1137_p10 }
 0x298   : > { %1145 = shalt.err (!%p1142_p6)
}
 0x299   : > { %s1218_s27 = smov 128   ;;  %s1219_s10 = smov 8  }
 0x29a   : > { %908 = dma.vmem_to_hbm [thread:$0]  (%p927_p11), %s680_s19, 2048, %s1475_s3, [#allocation5], %s1218_s27, %s1218_s27, %s1219_s10  }
 0x29b   : > { %1183 = dma.done.wait (%p927_p11), [#allocation5], 2048  }
 0x29c   : > { %1185 = vsyncadd (%p927_p11), [#allocation5], 4294965248 }
 0x29d PF: > { %s18_s17 = sadd.s32 1, %s1208_s17   ;;  %s1492_s29 = smov %s1499_s12 }
 0x29e   : > { %p15_p9 = scmp.ge.s32.totalorder %s18_s17, 5   ;;  %s1493_s12 = smov %s1192_s13 }
 0x29f   : > { %s1494_s13 = smov %s1196_s14  ;;  %s1495_s14 = smov %s1402_s5 }
 0x2a0   : > { %s1496_s15 = smov %s1204_s16  ;;  %s1497_s16 = smov %s1492_s29 }
 0x2a1   :  { %17 = sbr.rel (!%p15_p9) target bundleno = 6 (0x6), region = 88 }
 0x2a8   :  { %695 = vsyncpa [#allocation4], 1 }
 0x2a9   :  { %697 = vsyncpa [#allocation4 + $0x1], 1 }
 0x2aa   :  { %698 = vsyncpa [#allocation7], 1 }
 0x2ab   :  { %700 = vsyncpa [#allocation7 + $0x1], 1 }
 0x2ac   :  { %701 = vsyncpa [#allocation5], 1 }
 0x2ad   :  { %703 = vsyncpa [#allocation5 + $0x1], 1 }

</bundles_post_ra>
